<compile_context>
chip_gen: v5e
topology: v5e:2x2
jax: 0.10.0
libtpu: 0.0.40
codegen_flags: <defaults>
</compile_context>

<pallas_src>
import functools
import math

import jax
import jax.numpy as jnp
from jax import lax
from jax.experimental import pallas as pl
from jax.experimental.pallas import tpu as pltpu


def _round_up(x: int, m: int) -> int:
    return (x + m - 1) // m * m


def _vmem_budget_bytes() -> int:
    """Generation-aware usable-VMEM budget (leave ~25% headroom)."""
    try:
        cap = int(pltpu.get_tpu_info().vmem_capacity_bytes)
    except Exception:
        cap = 64 << 20  # conservative default: v7x per-core VMEM
    return (cap * 3) // 4


# ---------------------------------------------------------------------------
# Primary path: VMEM-resident table, per-token gather (no one-hot, no MXU).
# ---------------------------------------------------------------------------
def _resident_gather_kernel(scale, tb, vocab, unroll,
                            ids_ref, table_ref, out_ref):
    # ids_ref:   (n_pad,) int32 token ids, scalar-prefetched into SMEM
    # table_ref: (vocab, emb) native dtype, VMEM-resident (constant index_map)
    # out_ref:   (tb, emb)    lane-dense output tile
    base = pl.program_id(0) * tb

    def body(g, carry):
        row0 = pl.multiple_of(g * unroll, unroll)
        for u in range(unroll):  # short, statically unrolled inner loop
            t = row0 + u
            tok = jnp.clip(ids_ref[base + t], 0, vocab - 1)
            row = table_ref[pl.ds(tok, 1), :]
            out_ref[pl.ds(t, 1), :] = (row * scale).astype(out_ref.dtype)
        return carry

    lax.fori_loop(0, tb // unroll, body, 0)


# ---------------------------------------------------------------------------
# Fallback path (table does not fit in VMEM): batched manual-DMA row gather.
# ---------------------------------------------------------------------------
def _hbm_gather_kernel(scale, tb, vocab, n_inflight,
                       ids_ref, table_hbm, out_ref, rows, sems):
    # ids_ref:   (n_pad,) int32 ids in SMEM
    # table_hbm: (vocab, emb) raw HBM ref (pl.ANY)
    # rows:      (tb, emb) VMEM scratch the row DMAs land in
    # sems:      (n_inflight,) DMA semaphores (window of in-flight copies)
    base = pl.program_id(0) * tb

    def _copy(t, slot):
        tok = jnp.clip(ids_ref[base + t], 0, vocab - 1)
        return pltpu.make_async_copy(
            table_hbm.at[pl.ds(tok, 1), :],
            rows.at[pl.ds(t, 1), :],
            sems.at[slot],
        )

    def _wait(t, slot):
        # Shape-matched descriptor: wait only needs the semaphore + copy size.
        pltpu.make_async_copy(
            table_hbm.at[pl.ds(0, 1), :],
            rows.at[pl.ds(t, 1), :],
            sems.at[slot],
        ).wait()

    def issue(t, carry):
        slot = t % n_inflight

        @pl.when(t >= n_inflight)
        def _():
            _wait(t - n_inflight, slot)

        _copy(t, slot).start()
        return carry

    lax.fori_loop(0, tb, issue, 0)

    def drain(t, carry):
        _wait(t, t % n_inflight)
        return carry

    lax.fori_loop(max(tb - n_inflight, 0), tb, drain, 0)

    out_ref[...] = (rows[...] * scale).astype(out_ref.dtype)


# ---------------------------------------------------------------------------
# Public wrapper: emb_table[tokens] * sqrt(emb_size)
# ---------------------------------------------------------------------------
def token_embedding(tokens: jax.Array, emb_table: jax.Array,
                    *, block_tokens: int = 512) -> jax.Array:
    """tokens: integer ids of any shape; emb_table: (vocab, emb_size).

    Returns tokens.shape + (emb_size,) = emb_table[tokens] * sqrt(emb_size),
    in the table's dtype (matches nn.Embedding + scale).
    """
    tok_shape = tokens.shape
    vocab, emb = emb_table.shape
    n_tokens = math.prod(tok_shape) if tok_shape else 1
    scale = float(math.sqrt(emb))

    ids = tokens.reshape(n_tokens).astype(jnp.int32)  # tokens.long()

    # Token-block size: multiple of 8 sublanes, capped by the token count.
    tb = _round_up(min(block_tokens, _round_up(n_tokens, 8)), 8)
    n_pad = _round_up(n_tokens, tb)
    if n_pad != n_tokens:
        ids = jnp.pad(ids, (0, n_pad - n_tokens))  # pad with valid id 0

    grid = (n_pad // tb,)
    out_shape = jax.ShapeDtypeStruct((n_pad, emb), emb_table.dtype)

    # VMEM accounting (padded-tile footprints, table counted twice to cover
    # Pallas' default input double-buffering).
    itemsize = jnp.dtype(emb_table.dtype).itemsize
    emb_p = _round_up(emb, 128)
    table_vmem = _round_up(vocab, 32) * emb_p * itemsize
    out_vmem = 2 * tb * emb_p * itemsize
    slack = 2 << 20
    budget = _vmem_budget_bytes()
    needed_resident = 2 * table_vmem + out_vmem + slack

    if needed_resident <= budget:
        kernel = functools.partial(_resident_gather_kernel, scale, tb, vocab, 8)
        out_flat = pl.pallas_call(
            kernel,
            out_shape=out_shape,
            grid_spec=pltpu.PrefetchScalarGridSpec(
                num_scalar_prefetch=1,
                grid=grid,
                in_specs=[
                    # Full-array block + constant index => table DMA'd once,
                    # stays resident; no host-side pad/astype needed.
                    pl.BlockSpec((vocab, emb), lambda i, ids: (0, 0)),
                ],
                out_specs=pl.BlockSpec((tb, emb), lambda i, ids: (i, 0)),
            ),
            compiler_params=pltpu.CompilerParams(
                dimension_semantics=("parallel",),
                vmem_limit_bytes=int(min(budget,
                                         max(needed_resident, 32 << 20))),
            ),
        )(ids, emb_table)
    else:
        # Huge vocab: gather rows straight from HBM with a window of
        # in-flight row DMAs per token block.
        n_inflight = 16
        needed_fb = tb * emb_p * itemsize + out_vmem + slack
        kernel = functools.partial(_hbm_gather_kernel, scale, tb, vocab,
                                   n_inflight)
        out_flat = pl.pallas_call(
            kernel,
            out_shape=out_shape,
            grid_spec=pltpu.PrefetchScalarGridSpec(
                num_scalar_prefetch=1,
                grid=grid,
                in_specs=[pl.BlockSpec(memory_space=pl.ANY)],
                out_specs=pl.BlockSpec((tb, emb), lambda i, ids: (i, 0)),
                scratch_shapes=[
                    pltpu.VMEM((tb, emb), emb_table.dtype),
                    pltpu.SemaphoreType.DMA((n_inflight,)),
                ],
            ),
            compiler_params=pltpu.CompilerParams(
                dimension_semantics=("parallel",),
                vmem_limit_bytes=int(min(budget, max(needed_fb, 32 << 20))),
            ),
        )(ids, emb_table)

    if n_pad != n_tokens:
        out_flat = out_flat[:n_tokens]
    return out_flat.reshape(*tok_shape, emb)


if __name__ == "__main__":
    vocab_size = 64
    emb_size = 32
    seq = 8
    batch = 2

    key = jax.random.PRNGKey(0)
    k_emb, k_tok = jax.random.split(key)

    # Deterministic "parameters": nn.Embedding weight ~ N(0, 1)
    emb_table = jax.random.normal(k_emb, (vocab_size, emb_size),
                                  dtype=jnp.float32)
    tokens = jax.random.randint(k_tok, (seq, batch), 0, vocab_size,
                                dtype=jnp.int32)

    out = token_embedding(tokens, emb_table)
    out = jax.block_until_ready(out)

    # Reference check (plain JAX gather + scale) — gather path is exact.
    ref = jnp.take(emb_table, tokens, axis=0) * math.sqrt(emb_size)
    assert out.shape == (seq, batch, emb_size)
    assert jnp.allclose(out, ref, atol=1e-6, rtol=1e-6)

    print("KERNEL_OK")
</pallas_src>

<mosaic_0001>
module attributes {stable_mosaic.version = 11 : i64} {
  func.func @_resident_gather_kernel(%arg0: i32, %arg1: memref<16xi32, #tpu.memory_space<smem>>, %arg2: memref<64x32xf32, #tpu.memory_space<vmem>>, %arg3: memref<16x32xf32, #tpu.memory_space<vmem>>) attributes {dimension_semantics = [#tpu.dimension_semantics<parallel>], iteration_bounds = array<i64: 1>, scalar_prefetch = 1 : i64, scratch_operands = 0 : i64, tpu.core_type = #tpu.core_type<tc>, window_params = [{pipeline_mode = #tpu.pipeline_mode<synchronous>, transform_indices = @transform_0, window_bounds = array<i64: 64, 32>}, {transform_indices = @transform_1, window_bounds = array<i64: 16, 32>}]} {
    %c16_i32 = arith.constant 16 : i32
    %0 = arith.muli %arg0, %c16_i32 : i32
    %c0_i32 = arith.constant 0 : i32
    %c2_i32 = arith.constant 2 : i32
    %1 = arith.addi %c0_i32, %c2_i32 : i32
    %c1_i32 = arith.constant 1 : i32
    scf.for %arg4 = %c0_i32 to %1 step %c1_i32  : i32 {
      %c8_i32 = arith.constant 8 : i32
      %2 = arith.muli %arg4, %c8_i32 : i32
      %3 = tpu.assume_multiple %2, 8 : i32
      %c0_i32_1 = arith.constant 0 : i32
      %4 = arith.addi %3, %c0_i32_1 : i32
      %5 = arith.addi %0, %4 : i32
      %6 = arith.index_cast %5 : i32 to index
      %7 = memref.load %arg1[%6] : memref<16xi32, #tpu.memory_space<smem>>
      %c0_i32_2 = arith.constant 0 : i32
      %c63_i32 = arith.constant 63 : i32
      %8 = arith.maxsi %c0_i32_2, %7 : i32
      %9 = arith.minsi %c63_i32, %8 : i32
      %10 = arith.index_cast %9 : i32 to index
      %c0 = arith.constant 0 : index
      %11 = vector.load %arg2[%10, %c0] : memref<64x32xf32, #tpu.memory_space<vmem>>, vector<1x32xf32>
      %cst = arith.constant 5.65685415 : f32
      %12 = vector.broadcast %cst : f32 to vector<1x32xf32>
      %13 = arith.mulf %11, %12 : vector<1x32xf32>
      %14 = arith.index_cast %4 : i32 to index
      %c0_3 = arith.constant 0 : index
      %15 = vector.load %arg3[%14, %c0_3] : memref<16x32xf32, #tpu.memory_space<vmem>>, vector<1x32xf32>
      tpu.vector_store %arg3[%14, %c0_3], %13 {strides = array<i32>} : memref<16x32xf32, #tpu.memory_space<vmem>>, vector<1x32xf32>,
      %c1_i32_4 = arith.constant 1 : i32
      %16 = arith.addi %3, %c1_i32_4 : i32
      %17 = arith.addi %0, %16 : i32
      %18 = arith.index_cast %17 : i32 to index
      %19 = memref.load %arg1[%18] : memref<16xi32, #tpu.memory_space<smem>>
      %c0_i32_5 = arith.constant 0 : i32
      %c63_i32_6 = arith.constant 63 : i32
      %20 = arith.maxsi %c0_i32_5, %19 : i32
      %21 = arith.minsi %c63_i32_6, %20 : i32
      %22 = arith.index_cast %21 : i32 to index
      %c0_7 = arith.constant 0 : index
      %23 = vector.load %arg2[%22, %c0_7] : memref<64x32xf32, #tpu.memory_space<vmem>>, vector<1x32xf32>
      %cst_8 = arith.constant 5.65685415 : f32
      %24 = vector.broadcast %cst_8 : f32 to vector<1x32xf32>
      %25 = arith.mulf %23, %24 : vector<1x32xf32>
      %26 = arith.index_cast %16 : i32 to index
      %c0_9 = arith.constant 0 : index
      %27 = vector.load %arg3[%26, %c0_9] : memref<16x32xf32, #tpu.memory_space<vmem>>, vector<1x32xf32>
      tpu.vector_store %arg3[%26, %c0_9], %25 {strides = array<i32>} : memref<16x32xf32, #tpu.memory_space<vmem>>, vector<1x32xf32>,
      %c2_i32_10 = arith.constant 2 : i32
      %28 = arith.addi %3, %c2_i32_10 : i32
      %29 = arith.addi %0, %28 : i32
      %30 = arith.index_cast %29 : i32 to index
      %31 = memref.load %arg1[%30] : memref<16xi32, #tpu.memory_space<smem>>
      %c0_i32_11 = arith.constant 0 : i32
      %c63_i32_12 = arith.constant 63 : i32
      %32 = arith.maxsi %c0_i32_11, %31 : i32
      %33 = arith.minsi %c63_i32_12, %32 : i32
      %34 = arith.index_cast %33 : i32 to index
      %c0_13 = arith.constant 0 : index
      %35 = vector.load %arg2[%34, %c0_13] : memref<64x32xf32, #tpu.memory_space<vmem>>, vector<1x32xf32>
      %cst_14 = arith.constant 5.65685415 : f32
      %36 = vector.broadcast %cst_14 : f32 to vector<1x32xf32>
      %37 = arith.mulf %35, %36 : vector<1x32xf32>
      %38 = arith.index_cast %28 : i32 to index
      %c0_15 = arith.constant 0 : index
      %39 = vector.load %arg3[%38, %c0_15] : memref<16x32xf32, #tpu.memory_space<vmem>>, vector<1x32xf32>
      tpu.vector_store %arg3[%38, %c0_15], %37 {strides = array<i32>} : memref<16x32xf32, #tpu.memory_space<vmem>>, vector<1x32xf32>,
      %c3_i32 = arith.constant 3 : i32
      %40 = arith.addi %3, %c3_i32 : i32
      %41 = arith.addi %0, %40 : i32
      %42 = arith.index_cast %41 : i32 to index
      %43 = memref.load %arg1[%42] : memref<16xi32, #tpu.memory_space<smem>>
      %c0_i32_16 = arith.constant 0 : i32
      %c63_i32_17 = arith.constant 63 : i32
      %44 = arith.maxsi %c0_i32_16, %43 : i32
      %45 = arith.minsi %c63_i32_17, %44 : i32
      %46 = arith.index_cast %45 : i32 to index
      %c0_18 = arith.constant 0 : index
      %47 = vector.load %arg2[%46, %c0_18] : memref<64x32xf32, #tpu.memory_space<vmem>>, vector<1x32xf32>
      %cst_19 = arith.constant 5.65685415 : f32
      %48 = vector.broadcast %cst_19 : f32 to vector<1x32xf32>
      %49 = arith.mulf %47, %48 : vector<1x32xf32>
      %50 = arith.index_cast %40 : i32 to index
      %c0_20 = arith.constant 0 : index
      %51 = vector.load %arg3[%50, %c0_20] : memref<16x32xf32, #tpu.memory_space<vmem>>, vector<1x32xf32>
      tpu.vector_store %arg3[%50, %c0_20], %49 {strides = array<i32>} : memref<16x32xf32, #tpu.memory_space<vmem>>, vector<1x32xf32>,
      %c4_i32 = arith.constant 4 : i32
      %52 = arith.addi %3, %c4_i32 : i32
      %53 = arith.addi %0, %52 : i32
      %54 = arith.index_cast %53 : i32 to index
      %55 = memref.load %arg1[%54] : memref<16xi32, #tpu.memory_space<smem>>
      %c0_i32_21 = arith.constant 0 : i32
      %c63_i32_22 = arith.constant 63 : i32
      %56 = arith.maxsi %c0_i32_21, %55 : i32
      %57 = arith.minsi %c63_i32_22, %56 : i32
      %58 = arith.index_cast %57 : i32 to index
      %c0_23 = arith.constant 0 : index
      %59 = vector.load %arg2[%58, %c0_23] : memref<64x32xf32, #tpu.memory_space<vmem>>, vector<1x32xf32>
      %cst_24 = arith.constant 5.65685415 : f32
      %60 = vector.broadcast %cst_24 : f32 to vector<1x32xf32>
      %61 = arith.mulf %59, %60 : vector<1x32xf32>
      %62 = arith.index_cast %52 : i32 to index
      %c0_25 = arith.constant 0 : index
      %63 = vector.load %arg3[%62, %c0_25] : memref<16x32xf32, #tpu.memory_space<vmem>>, vector<1x32xf32>
      tpu.vector_store %arg3[%62, %c0_25], %61 {strides = array<i32>} : memref<16x32xf32, #tpu.memory_space<vmem>>, vector<1x32xf32>,
      %c5_i32 = arith.constant 5 : i32
      %64 = arith.addi %3, %c5_i32 : i32
      %65 = arith.addi %0, %64 : i32
      %66 = arith.index_cast %65 : i32 to index
      %67 = memref.load %arg1[%66] : memref<16xi32, #tpu.memory_space<smem>>
      %c0_i32_26 = arith.constant 0 : i32
      %c63_i32_27 = arith.constant 63 : i32
      %68 = arith.maxsi %c0_i32_26, %67 : i32
      %69 = arith.minsi %c63_i32_27, %68 : i32
      %70 = arith.index_cast %69 : i32 to index
      %c0_28 = arith.constant 0 : index
      %71 = vector.load %arg2[%70, %c0_28] : memref<64x32xf32, #tpu.memory_space<vmem>>, vector<1x32xf32>
      %cst_29 = arith.constant 5.65685415 : f32
      %72 = vector.broadcast %cst_29 : f32 to vector<1x32xf32>
      %73 = arith.mulf %71, %72 : vector<1x32xf32>
      %74 = arith.index_cast %64 : i32 to index
      %c0_30 = arith.constant 0 : index
      %75 = vector.load %arg3[%74, %c0_30] : memref<16x32xf32, #tpu.memory_space<vmem>>, vector<1x32xf32>
      tpu.vector_store %arg3[%74, %c0_30], %73 {strides = array<i32>} : memref<16x32xf32, #tpu.memory_space<vmem>>, vector<1x32xf32>,
      %c6_i32 = arith.constant 6 : i32
      %76 = arith.addi %3, %c6_i32 : i32
      %77 = arith.addi %0, %76 : i32
      %78 = arith.index_cast %77 : i32 to index
      %79 = memref.load %arg1[%78] : memref<16xi32, #tpu.memory_space<smem>>
      %c0_i32_31 = arith.constant 0 : i32
      %c63_i32_32 = arith.constant 63 : i32
      %80 = arith.maxsi %c0_i32_31, %79 : i32
      %81 = arith.minsi %c63_i32_32, %80 : i32
      %82 = arith.index_cast %81 : i32 to index
      %c0_33 = arith.constant 0 : index
      %83 = vector.load %arg2[%82, %c0_33] : memref<64x32xf32, #tpu.memory_space<vmem>>, vector<1x32xf32>
      %cst_34 = arith.constant 5.65685415 : f32
      %84 = vector.broadcast %cst_34 : f32 to vector<1x32xf32>
      %85 = arith.mulf %83, %84 : vector<1x32xf32>
      %86 = arith.index_cast %76 : i32 to index
      %c0_35 = arith.constant 0 : index
      %87 = vector.load %arg3[%86, %c0_35] : memref<16x32xf32, #tpu.memory_space<vmem>>, vector<1x32xf32>
      tpu.vector_store %arg3[%86, %c0_35], %85 {strides = array<i32>} : memref<16x32xf32, #tpu.memory_space<vmem>>, vector<1x32xf32>,
      %c7_i32 = arith.constant 7 : i32
      %88 = arith.addi %3, %c7_i32 : i32
      %89 = arith.addi %0, %88 : i32
      %90 = arith.index_cast %89 : i32 to index
      %91 = memref.load %arg1[%90] : memref<16xi32, #tpu.memory_space<smem>>
      %c0_i32_36 = arith.constant 0 : i32
      %c63_i32_37 = arith.constant 63 : i32
      %92 = arith.maxsi %c0_i32_36, %91 : i32
      %93 = arith.minsi %c63_i32_37, %92 : i32
      %94 = arith.index_cast %93 : i32 to index
      %c0_38 = arith.constant 0 : index
      %95 = vector.load %arg2[%94, %c0_38] : memref<64x32xf32, #tpu.memory_space<vmem>>, vector<1x32xf32>
      %cst_39 = arith.constant 5.65685415 : f32
      %96 = vector.broadcast %cst_39 : f32 to vector<1x32xf32>
      %97 = arith.mulf %95, %96 : vector<1x32xf32>
      %98 = arith.index_cast %88 : i32 to index
      %c0_40 = arith.constant 0 : index
      %99 = vector.load %arg3[%98, %c0_40] : memref<16x32xf32, #tpu.memory_space<vmem>>, vector<1x32xf32>
      tpu.vector_store %arg3[%98, %c0_40], %97 {strides = array<i32>} : memref<16x32xf32, #tpu.memory_space<vmem>>, vector<1x32xf32>,
    }
    %c2_i32_0 = arith.constant 2 : i32
    return
  }
  func.func @transform_0(%arg0: i32, %arg1: memref<16xi32, #tpu.memory_space<smem>>) -> (i32, i32) {
    %c0_i32 = arith.constant 0 : i32
    %c0_i32_0 = arith.constant 0 : i32
    %c0_i32_1 = arith.constant 0 : i32
    return %c0_i32, %c0_i32_0 : i32, i32
  }
  func.func @transform_1(%arg0: i32, %arg1: memref<16xi32, #tpu.memory_space<smem>>) -> (i32, i32) {
    %c0_i32 = arith.constant 0 : i32
    %c0_i32_0 = arith.constant 0 : i32
    return %arg0, %c0_i32 : i32, i32
  }
}

</mosaic_0001>

<bundles_post_ra>
// kernel: tpu_custom_call.1
= control target key start
LH: loop header
LB: loop body
LE: loop exit
PB: predicated region body
PF: predicated region fallthrough
CT: control target
= control target key end

     0   :  { %s307_s12 = smov [#allocation3]   ;;  %s418_s0 = inlined_call_operand.vmem [shape: s32[16], index: 0, kind: input, shape index: {}]   ;;  %s419_s1 = inlined_call_operand.vmem [shape: f32[64,32], index: 1, kind: input, shape index: {}]   ;;  %s420_s2 = inlined_call_operand.hbm [shape: f32[16,32], index: 2, kind: output, shape index: {}]  }
   0x1   :  { %s8_s11 = sshll.u32 %s418_s0, 4  ;;  %s9_s11 = int_to_ptr.vmem [resolvable:$true] %s8_s11 }
   0x2   :  { %11 = dma.vmem_to_smem %s9_s11, 16, %s307_s12, [#allocation2] }
   0x3   :  { %299 = dma.done.wait [#allocation2], 16 }
   0x4   :  { %300 = vsyncadd [#allocation2], 4294967280 }
   0x5   :  { %14 = sfence }
   0x6   :  { %15 = vsyncpa [#allocation5], 0  ;;  %s329_s13 = smov 0  }
   0x7 LB: > { %s335_s14 = sshll.u32 %s305_s13, 3  ;;  %vm36_vm0 = vcmask 253952   ;;  %s24_s13 = sadd.s32 1, %s305_s13   ;;  %s305_s13 = sphi %s329_s13, %s24_s13  }
   0x8   : > { %s27_s0 = sld [smem:[#allocation3 + %s335_s14]]  ;;  %s38_s15 = sadd.s32 1, %s335_s14 }
   0x9   : > { %s50_s16 = sadd.s32 2, %s335_s14  ;;  %s40_s17 = sld [smem:[#allocation3 + %s38_s15]] }
   0xa   : > { %s62_s18 = sadd.s32 3, %s335_s14  ;;  %s341_s19 = sld [smem:[#allocation3 + %s50_s16]] }
   0xb   : > { %s74_s20 = sadd.s32 4, %s335_s14  ;;  %s344_s21 = sld [smem:[#allocation3 + %s62_s18]] }
   0xc   : > { %s86_s22 = sadd.s32 5, %s335_s14  ;;  %s347_s23 = sld [smem:[#allocation3 + %s74_s20]] }
   0xd   : > { %s98_s24 = sadd.s32 6, %s335_s14  ;;  %s350_s25 = sld [smem:[#allocation3 + %s86_s22]] }
   0xe   : > { %p28_p0 = scmp.gt.s32.totalorder %s27_s0, 0  ;;  %p177_p1 = scmp.lt.s32.totalorder %s27_s0, 63 }
   0xf   : > { %s110_s26 = sadd.s32 7, %s335_s14  ;;  %p41_p2 = scmp.gt.s32.totalorder %s40_s17, 0 }
  0x10   : > { %s422_s0 = smov (!%p28_p0, %s27_s0), 0  ;;  %p182_p3 = scmp.lt.s32.totalorder %s40_s17, 63 }
  0x11   : > { %s424_s0 = smov (!%p177_p1, %s422_s0), 63  ;;  %s426_s17 = smov (!%p41_p2, %s40_s17), 0 }
  0x12   : > { %s32_s29 = scalar_lea.vmem %s419_s1, %s424_s0  ;;  %p53_p4 = scmp.gt.s32.totalorder %s341_s19, 0 }
  0x13   : > { %v33_v0 = vld [vmem:[%s32_s29] sm:$0x1]  ;;  %s428_s17 = smov (!%p182_p3, %s426_s17), 63  ;;  %p189_p5 = scmp.lt.s32.totalorder %s341_s19, 63 }
  0x14   : > { %v34_v1 = vmul.f32 5.656854, %v33_v0  ;;  %s54_s30 = scalar_select %p53_p4, %s341_s19, 0 }
  0x15   : > { %s45_s5 = scalar_lea.vmem %s419_s1, %s428_s17  ;;  %s363_s6 = scalar_lea.vmem [#allocation4], %s335_s14 }
  0x16   : > { %37 = vst.msk [vmem:[%s363_s6] sm:$0x1] %vm36_vm0, %v34_v1  ;;  %v46_v2 = vld [vmem:[%s45_s5] sm:$0x1]  ;;  %p65_p6 = scmp.gt.s32.totalorder %s344_s21, 0  ;;  %p196_p7 = scmp.lt.s32.totalorder %s344_s21, 63 }
  0x17   : > { %v47_v3 = vmul.f32 5.656854, %v46_v2  ;;  %s430_s30 = smov (!%p189_p5, %s54_s30), 63  ;;  %p77_p8 = scmp.gt.s32.totalorder %s347_s23, 0 }
  0x18   : > { %s432_s21 = smov (!%p65_p6, %s344_s21), 0  ;;  %s57_s9 = scalar_lea.vmem %s419_s1, %s430_s30 }
  0x19   : > { %188 = vst.msk [vmem:[%s363_s6 + $0x1] sm:$0x1] %vm36_vm0, %v47_v3  ;;  %v58_v4 = vld [vmem:[%s57_s9] sm:$0x1]  ;;  %s434_s21 = smov (!%p196_p7, %s432_s21), 63  ;;  %p203_p9 = scmp.lt.s32.totalorder %s347_s23, 63 }
  0x1a   : > { %v59_v5 = vmul.f32 5.656854, %v58_v4  ;;  %s78_s10 = scalar_select %p77_p8, %s347_s23, 0 }
  0x1b   : > { %s69_s0 = scalar_lea.vmem %s419_s1, %s434_s21  ;;  %p89_p10 = scmp.gt.s32.totalorder %s350_s25, 0 }
  0x1c   : > { %195 = vst.msk [vmem:[%s363_s6 + $0x2] sm:$0x1] %vm36_vm0, %v59_v5  ;;  %v70_v6 = vld [vmem:[%s69_s0] sm:$0x1]  ;;  %p210_p11 = scmp.lt.s32.totalorder %s350_s25, 63  ;;  %s436_s10 = smov (!%p203_p9, %s78_s10), 63 }
  0x1d   : > { %v71_v7 = vmul.f32 5.656854, %v70_v6  ;;  %s438_s25 = smov (!%p89_p10, %s350_s25), 0  ;;  %s81_s17 = scalar_lea.vmem %s419_s1, %s436_s10 }
  0x1e   : > { %s100_s18 = sld [smem:[#allocation3 + %s98_s24]]  ;;  %v82_v8 = vld [vmem:[%s81_s17] sm:$0x1]  ;;  %s440_s25 = smov (!%p210_p11, %s438_s25), 63 }
  0x1f   : > { %202 = vst.msk [vmem:[%s363_s6 + $0x3] sm:$0x1] %vm36_vm0, %v71_v7  ;;  %v83_v9 = vmul.f32 5.656854, %v82_v8  ;;  %s112_s19 = sld [smem:[#allocation3 + %s110_s26]]  ;;  %s93_s22 = scalar_lea.vmem %s419_s1, %s440_s25 }
  0x20   : > { %v94_v10 = vld [vmem:[%s93_s22] sm:$0x1]  ;;  %p21_p2 = scmp.ge.s32.totalorder %s24_s13, 2  }
  0x21   : > { %209 = vst.msk [vmem:[%s363_s6 + $0x4] sm:$0x1] %vm36_vm0, %v83_v9  ;;  %v95_v11 = vmul.f32 5.656854, %v94_v10  ;;  %s128_s30 = sshll.u32 (%p21_p2), %s420_s2, 4  ;;  %s308_s3 = smov (%p21_p2), [#allocation4]   ;;  %s129_s30 = int_to_ptr.hbm [resolvable:$true] %s128_s30 }
  0x22   :  { %s126_s4 = sshll.u32 (%p21_p2), %s308_s3, 4  ;;  %s309_s5 = smov (%p21_p2), 128   ;;  %s127_s4 = int_to_ptr.vmem [resolvable:$true] %s126_s4 }
  0x23   : > { %216 = vst.msk [vmem:[%s363_s6 + $0x5] sm:$0x1] %vm36_vm0, %v95_v11  ;;  %s310_s7 = smov (%p21_p2), 8  }
  0x24   : > { %p101_p12 = scmp.gt.s32.totalorder %s100_s18, 0  ;;  %p217_p13 = scmp.lt.s32.totalorder %s100_s18, 63 }
  0x25   : > { %p113_p0 = scmp.gt.s32.totalorder %s112_s19, 0  ;;  %p224_p1 = scmp.lt.s32.totalorder %s112_s19, 63 }
  0x26   : > { %s442_s18 = smov (!%p101_p12, %s100_s18), 0 }
  0x27   : > { %s444_s18 = smov (!%p217_p13, %s442_s18), 63  ;;  %s446_s19 = smov (!%p113_p0, %s112_s19), 0 }
  0x28   : > { %s105_s24 = scalar_lea.vmem %s419_s1, %s444_s18  ;;  %s448_s19 = smov (!%p224_p1, %s446_s19), 63 }
  0x29   : > { %v106_v12 = vld [vmem:[%s105_s24] sm:$0x1]  ;;  %s117_s27 = scalar_lea.vmem %s419_s1, %s448_s19  ;;  %23 = sbr.rel (!%p21_p2) target bundleno = 7 (0x7), region = 47 }
  0x2a   : > { %v107_v13 = vmul.f32 5.656854, %v106_v12  ;;  %v118_v14 = vld [vmem:[%s117_s27] sm:$0x1] }
  0x2b   : > { %v119_v15 = vmul.f32 5.656854, %v118_v14 }
  0x2c   : > { %223 = vst.msk [vmem:[%s363_s6 + $0x6] sm:$0x1] %vm36_vm0, %v107_v13 }
  0x2d   : > { %230 = vst.msk [vmem:[%s363_s6 + $0x7] sm:$0x1] %vm36_vm0, %v119_v15 }
  0x2e   :  { %134 = dma.vmem_to_hbm [thread:$0]  %s127_s4, 256, %s129_s30, [#allocation5], %s309_s5, %s309_s5, %s310_s7  }
  0x2f   :  { %301 = dma.done.wait [#allocation5], 256  }
  0x30   :  { %302 = vsyncadd [#allocation5], 4294967040 }
  0x31   :  { %139 = vsyncpa [#allocation5], 1 }

</bundles_post_ra>
